<compile_context>
chip_gen: v7x
topology: tpu7x:2x2x1
jax: 0.10.0
libtpu: 0.0.40
codegen_flags: <defaults>
</compile_context>

<pallas_src>
import functools

import jax
import jax.numpy as jnp
from jax import lax
from jax.experimental import pallas as pl
from jax.experimental.pallas import tpu as pltpu

_OUT_LANES = 128  # lane-dense output slab; columns: 0=mu, 1=sigma, 2=action


def _actor_kernel(x_ref, w1_ref, b1_ref, wh_ref, bh_ref, eps_ref, out_ref, *,
                  act_lo, act_hi):
    B, n_states = x_ref.shape
    n_middle = w1_ref.shape[1]

    x = x_ref[...]                                     # (B, n_states)
    w1 = w1_ref[...]                                   # (n_states, n_middle)

    # ---- Layer 1 on the VPU: K=3 contraction as 3 broadcast-FMAs (skip MXU). ----
    h = jnp.broadcast_to(b1_ref[...], (B, n_middle))
    for k in range(n_states):                          # n_states is static (=3)
        h = h + x[:, k:k + 1] * w1[k:k + 1, :]
    h = jnp.maximum(h, 0.0)                            # ReLU

    # ---- Fused mu|sigma head: one (n_middle, 2) matmul on the MXU. ----
    s = jnp.dot(h, wh_ref[...], preferred_element_type=jnp.float32) + bh_ref[...]
    mu = 2.0 * jnp.tanh(s[:, 0:1])                     # (B, 1)
    s_sig = s[:, 1:2]
    # numerically stable softplus: max(s,0) + log1p(exp(-|s|))
    sigma = jnp.maximum(s_sig, 0.0) + jnp.log1p(jnp.exp(-jnp.abs(s_sig))) + 0.1

    # ---- In-kernel Normal(mu, sigma) sample (eps provided) + clamp. ----
    action = jnp.clip(mu + sigma * eps_ref[...], act_lo, act_hi)   # (B, 1)

    # ---- Single lane-dense (B, 128) store: col 0 = mu, 1 = sigma, 2 = action. ----
    col = lax.broadcasted_iota(jnp.int32, (B, _OUT_LANES), 1)
    out = jnp.where(col == 0, mu,
          jnp.where(col == 1, sigma,
          jnp.where(col == 2, action, 0.0)))
    out_ref[...] = out


def actor_forward_pallas(x, params, action_bound, eps):
    """One Pallas call: returns (action, mu2, sigma01), each of shape (B,)."""
    B, n_states = x.shape
    n_middle = params["w1"].shape[1]
    act_lo = float(action_bound[0][0])
    act_hi = float(action_bound[1][0])

    kernel = functools.partial(_actor_kernel, act_lo=act_lo, act_hi=act_hi)
    vmem = pl.BlockSpec(memory_space=pltpu.MemorySpace.VMEM)

    bytes_accessed = 4 * (x.size + params["w1"].size + params["b1"].size
                          + params["w_head"].size + params["b_head"].size
                          + eps.size + B * _OUT_LANES)
    cost = pl.CostEstimate(
        flops=int(2 * B * (n_states * n_middle + n_middle * 2)),
        transcendentals=int(3 * B),          # tanh + exp + log1p per row
        bytes_accessed=int(bytes_accessed),
    )

    # TODO(synk): if B ever grows large (vectorized envs), add a batch grid
    # (grid=(pl.cdiv(B, TILE_B),), dimension_semantics=("parallel",)) so v7x's
    # second TensorCore is used; at B=8 a single whole-array block is optimal.
    out = pl.pallas_call(
        kernel,
        out_shape=jax.ShapeDtypeStruct((B, _OUT_LANES), jnp.float32),
        in_specs=[vmem] * 6,
        out_specs=vmem,
        cost_estimate=cost,
    )(x, params["w1"], params["b1"], params["w_head"], params["b_head"], eps)

    mu = out[:, 0]        # (B,)
    sigma = out[:, 1]     # (B,)
    action = out[:, 2]    # (B,)
    return action, mu, sigma


def init_params(key, n_states, n_middle=30):
    """Matches the torch module's __init__: weights ~ N(0, 0.1); biases use
    torch's default U(-1/sqrt(fan_in), 1/sqrt(fan_in)). The two heads are stored
    pre-fused as a single (n_middle, 2) weight / (1, 2) bias (col0=mu, col1=sigma)."""
    k = jax.random.split(key, 6)

    def bias(kk, fan_in, n):
        bound = 1.0 / jnp.sqrt(jnp.float32(fan_in))
        return jax.random.uniform(kk, (1, n), jnp.float32, -bound, bound)

    wmu = 0.1 * jax.random.normal(k[2], (n_middle, 1), jnp.float32)
    bmu = bias(k[3], n_middle, 1)
    wsig = 0.1 * jax.random.normal(k[4], (n_middle, 1), jnp.float32)
    bsig = bias(k[5], n_middle, 1)
    return {
        "w1": 0.1 * jax.random.normal(k[0], (n_states, n_middle), jnp.float32),
        "b1": bias(k[1], n_states, n_middle),
        "w_head": jnp.concatenate([wmu, wsig], axis=1),   # (n_middle, 2)
        "b_head": jnp.concatenate([bmu, bsig], axis=1),   # (1, 2)
    }


def actor_net_forward(x, params, action_bound, sample_key):
    """Full ActorNet.forward. The Normal(mu, sigma) distribution object is
    represented by its parameters (mu, sigma); its single sample + clamp is
    computed inside the Pallas kernel from a standard-normal eps."""
    B = x.shape[0]
    eps = jax.random.normal(sample_key, (B, 1), jnp.float32)
    action, mu, sigma = actor_forward_pallas(x, params, action_bound, eps)
    action = action.reshape(1, B)   # torch: Normal(...).sample((1,)) -> (1, B)
    return action, (mu, sigma)


if __name__ == "__main__":
    n_states, n_actions, n_middle = 3, 1, 30   # Pendulum-v1
    batch = 8
    action_bound = [[-2.0], [2.0]]

    key = jax.random.PRNGKey(0)
    k_param, k_x, k_sample = jax.random.split(key, 3)

    params = init_params(k_param, n_states, n_middle)
    x = jax.random.normal(k_x, (batch, n_states), jnp.float32)

    action, (mu, sigma) = actor_net_forward(x, params, action_bound, k_sample)
    jax.block_until_ready((action, mu, sigma))

    # Pure-JAX reference of the same math (same eps).
    h_ref = jnp.maximum(x @ params["w1"] + params["b1"], 0.0)
    s_ref = h_ref @ params["w_head"] + params["b_head"]
    mu_ref = 2.0 * jnp.tanh(s_ref[:, 0])
    sig_ref = jax.nn.softplus(s_ref[:, 1]) + 0.1
    eps_ref = jax.random.normal(k_sample, (batch, 1), jnp.float32)[:, 0]
    act_ref = jnp.clip(mu_ref + sig_ref * eps_ref,
                       action_bound[0][0], action_bound[1][0]).reshape(1, batch)

    assert jnp.allclose(mu, mu_ref, atol=1e-5), "mu mismatch"
    assert jnp.allclose(sigma, sig_ref, atol=1e-5), "sigma mismatch"
    assert jnp.allclose(action, act_ref, atol=1e-5), "action mismatch"
    assert action.shape == (1, batch)
    assert bool(jnp.all(action >= action_bound[0][0]))
    assert bool(jnp.all(action <= action_bound[1][0]))
    assert bool(jnp.all(sigma > 0.1 - 1e-6))

    print("KERNEL_OK")
</pallas_src>

<mosaic_0001>
module attributes {stable_mosaic.version = 11 : i64} {
  func.func @_actor_kernel(%arg0: memref<8x3xf32, #tpu.memory_space<vmem>>, %arg1: memref<3x30xf32, #tpu.memory_space<vmem>>, %arg2: memref<1x30xf32, #tpu.memory_space<vmem>>, %arg3: memref<30x2xf32, #tpu.memory_space<vmem>>, %arg4: memref<1x2xf32, #tpu.memory_space<vmem>>, %arg5: memref<8x1xf32, #tpu.memory_space<vmem>>, %arg6: memref<8x128xf32, #tpu.memory_space<vmem>>) attributes {dimension_semantics = [], scalar_prefetch = 0 : i64, scratch_operands = 0 : i64, tpu.core_type = #tpu.core_type<tc>} {
    %c0 = arith.constant 0 : index
    %c0_0 = arith.constant 0 : index
    %0 = vector.load %arg0[%c0, %c0_0] : memref<8x3xf32, #tpu.memory_space<vmem>>, vector<8x3xf32>
    %c0_1 = arith.constant 0 : index
    %c0_2 = arith.constant 0 : index
    %1 = vector.load %arg1[%c0_1, %c0_2] : memref<3x30xf32, #tpu.memory_space<vmem>>, vector<3x30xf32>
    %c0_3 = arith.constant 0 : index
    %c0_4 = arith.constant 0 : index
    %2 = vector.load %arg2[%c0_3, %c0_4] : memref<1x30xf32, #tpu.memory_space<vmem>>, vector<1x30xf32>
    %3 = vector.shape_cast %2 : vector<1x30xf32> to vector<1x30xf32>
    %4 = vector.broadcast %3 : vector<1x30xf32> to vector<8x30xf32>
    %5 = vector.extract_strided_slice %0 {offsets = [0, 0], sizes = [8, 1], strides = [1, 1]} : vector<8x3xf32> to vector<8x1xf32>
    %6 = vector.extract_strided_slice %1 {offsets = [0, 0], sizes = [1, 30], strides = [1, 1]} : vector<3x30xf32> to vector<1x30xf32>
    %7 = vector.broadcast %5 : vector<8x1xf32> to vector<8x30xf32>
    %8 = vector.broadcast %6 : vector<1x30xf32> to vector<8x30xf32>
    %9 = arith.mulf %7, %8 : vector<8x30xf32>
    %10 = arith.addf %4, %9 : vector<8x30xf32>
    %11 = vector.extract_strided_slice %0 {offsets = [0, 1], sizes = [8, 1], strides = [1, 1]} : vector<8x3xf32> to vector<8x1xf32>
    %12 = vector.extract_strided_slice %1 {offsets = [1, 0], sizes = [1, 30], strides = [1, 1]} : vector<3x30xf32> to vector<1x30xf32>
    %13 = vector.broadcast %11 : vector<8x1xf32> to vector<8x30xf32>
    %14 = vector.broadcast %12 : vector<1x30xf32> to vector<8x30xf32>
    %15 = arith.mulf %13, %14 : vector<8x30xf32>
    %16 = arith.addf %10, %15 : vector<8x30xf32>
    %17 = vector.extract_strided_slice %0 {offsets = [0, 2], sizes = [8, 1], strides = [1, 1]} : vector<8x3xf32> to vector<8x1xf32>
    %18 = vector.extract_strided_slice %1 {offsets = [2, 0], sizes = [1, 30], strides = [1, 1]} : vector<3x30xf32> to vector<1x30xf32>
    %19 = vector.broadcast %17 : vector<8x1xf32> to vector<8x30xf32>
    %20 = vector.broadcast %18 : vector<1x30xf32> to vector<8x30xf32>
    %21 = arith.mulf %19, %20 : vector<8x30xf32>
    %22 = arith.addf %16, %21 : vector<8x30xf32>
    %cst = arith.constant 0.000000e+00 : f32
    %23 = vector.broadcast %cst : f32 to vector<8x30xf32>
    %24 = arith.maximumf %22, %23 : vector<8x30xf32>
    %c0_5 = arith.constant 0 : index
    %c0_6 = arith.constant 0 : index
    %25 = vector.load %arg3[%c0_5, %c0_6] : memref<30x2xf32, #tpu.memory_space<vmem>>, vector<30x2xf32>
    %cst_7 = arith.constant dense<0.000000e+00> : vector<8x2xf32>
    %26 = tpu.matmul %24, %25, %cst_7 {dimension_numbers = #tpu.dot_dimension_numbers<[1], [0], [0], [1], [0, 0, 1, 1], [], []>} : vector<8x30xf32>, vector<30x2xf32>, vector<8x2xf32> -> vector<8x2xf32>
    %c0_8 = arith.constant 0 : index
    %c0_9 = arith.constant 0 : index
    %27 = vector.load %arg4[%c0_8, %c0_9] : memref<1x2xf32, #tpu.memory_space<vmem>>, vector<1x2xf32>
    %28 = vector.broadcast %27 : vector<1x2xf32> to vector<8x2xf32>
    %29 = arith.addf %26, %28 : vector<8x2xf32>
    %30 = vector.extract_strided_slice %29 {offsets = [0, 0], sizes = [8, 1], strides = [1, 1]} : vector<8x2xf32> to vector<8x1xf32>
    %31 = math.tanh %30 : vector<8x1xf32>
    %cst_10 = arith.constant 2.000000e+00 : f32
    %32 = vector.broadcast %cst_10 : f32 to vector<8x1xf32>
    %33 = arith.mulf %32, %31 : vector<8x1xf32>
    %34 = vector.extract_strided_slice %29 {offsets = [0, 1], sizes = [8, 1], strides = [1, 1]} : vector<8x2xf32> to vector<8x1xf32>
    %cst_11 = arith.constant 0.000000e+00 : f32
    %35 = vector.broadcast %cst_11 : f32 to vector<8x1xf32>
    %36 = arith.maximumf %34, %35 : vector<8x1xf32>
    %37 = math.absf %34 : vector<8x1xf32>
    %cst_12 = arith.constant 0.000000e+00 : f32
    %38 = vector.broadcast %cst_12 : f32 to vector<8x1xf32>
    %39 = arith.subf %38, %37 : vector<8x1xf32>
    %40 = math.exp %39 : vector<8x1xf32>
    %41 = math.log1p %40 : vector<8x1xf32>
    %42 = arith.addf %36, %41 : vector<8x1xf32>
    %cst_13 = arith.constant 1.000000e-01 : f32
    %43 = vector.broadcast %cst_13 : f32 to vector<8x1xf32>
    %44 = arith.addf %42, %43 : vector<8x1xf32>
    %c0_14 = arith.constant 0 : index
    %c0_15 = arith.constant 0 : index
    %45 = vector.load %arg5[%c0_14, %c0_15] : memref<8x1xf32, #tpu.memory_space<vmem>>, vector<8x1xf32>
    %46 = arith.mulf %44, %45 : vector<8x1xf32>
    %47 = arith.addf %33, %46 : vector<8x1xf32>
    %cst_16 = arith.constant -2.000000e+00 : f32
    %cst_17 = arith.constant 2.000000e+00 : f32
    %48 = vector.broadcast %cst_16 : f32 to vector<8x1xf32>
    %49 = arith.maximumf %48, %47 : vector<8x1xf32>
    %50 = vector.broadcast %cst_17 : f32 to vector<8x1xf32>
    %51 = arith.minimumf %50, %49 : vector<8x1xf32>
    %52 = tpu.iota {dimensions = array<i32: 1>} : vector<8x128xi32>
    %c0_i32 = arith.constant 0 : i32
    %53 = vector.broadcast %c0_i32 : i32 to vector<8x128xi32>
    %54 = arith.cmpi eq, %52, %53 : vector<8x128xi32>
    %c1_i32 = arith.constant 1 : i32
    %55 = vector.broadcast %c1_i32 : i32 to vector<8x128xi32>
    %56 = arith.cmpi eq, %52, %55 : vector<8x128xi32>
    %c2_i32 = arith.constant 2 : i32
    %57 = vector.broadcast %c2_i32 : i32 to vector<8x128xi32>
    %58 = arith.cmpi eq, %52, %57 : vector<8x128xi32>
    %cst_18 = arith.constant 0.000000e+00 : f32
    %59 = vector.shape_cast %51 : vector<8x1xf32> to vector<8x1xf32>
    %60 = vector.broadcast %59 : vector<8x1xf32> to vector<8x128xf32>
    %61 = vector.broadcast %cst_18 : f32 to vector<8x128xf32>
    %62 = arith.select %58, %60, %61 : vector<8x128xi1>, vector<8x128xf32>
    %63 = vector.shape_cast %44 : vector<8x1xf32> to vector<8x1xf32>
    %64 = vector.broadcast %63 : vector<8x1xf32> to vector<8x128xf32>
    %65 = arith.select %56, %64, %62 : vector<8x128xi1>, vector<8x128xf32>
    %66 = vector.shape_cast %33 : vector<8x1xf32> to vector<8x1xf32>
    %67 = vector.broadcast %66 : vector<8x1xf32> to vector<8x128xf32>
    %68 = arith.select %54, %67, %65 : vector<8x128xi1>, vector<8x128xf32>
    %c0_19 = arith.constant 0 : index
    %c0_20 = arith.constant 0 : index
    %69 = vector.load %arg6[%c0_19, %c0_20] : memref<8x128xf32, #tpu.memory_space<vmem>>, vector<8x128xf32>
    tpu.vector_store %arg6[%c0_19, %c0_20], %68 {strides = array<i32>} : memref<8x128xf32, #tpu.memory_space<vmem>>, vector<8x128xf32>,
    return
  }
}

</mosaic_0001>

<bundles_post_ra>
// kernel: tpu_custom_call.1
= control target key start
LH: loop header
LB: loop body
LE: loop exit
PB: predicated region body
PF: predicated region fallthrough
CT: control target
= control target key end

     0   :  { %v297_v1 = vmov 0   ;;  %v298_v2 = vmov 2   ;;  %s384_s0 = inlined_call_operand.vmem [shape: f32[8,3], index: 0, kind: input, shape index: {}]   ;;  %s385_s1 = inlined_call_operand.vmem [shape: f32[3,30], index: 1, kind: input, shape index: {}]   ;;  %s386_s2 = inlined_call_operand.vmem [shape: f32[1,30], index: 2, kind: input, shape index: {}]   ;;  %s387_s3 = inlined_call_operand.vmem [shape: f32[30,2], index: 3, kind: input, shape index: {}]   ;;  %s388_s4 = inlined_call_operand.vmem [shape: f32[1,2], index: 4, kind: input, shape index: {}]   ;;  %s389_s5 = inlined_call_operand.vmem [shape: f32[8,1], index: 5, kind: input, shape index: {}]   ;;  %s390_s6 = inlined_call_operand.hbm [shape: f32[8,128], index: 6, kind: output, shape index: {}]  }
   0x1   :  { %v24_v0 = vld [vmem:[%s384_s0] sm:$0xff]  ;;  %261 = vset.pattern.permute.xlu0 %v297_v1  ;;  %263 = vset.pattern.permute.xlu1 %v298_v2 }
   0x2   :  { %11 = vsyncpa [#allocation3], 0  ;;  %35 = vperm.xlu0 %261, %v24_v0   ;;  %55 = vperm.xlu1 %263, %v24_v0   ;;  %v65_v3 = vld [vmem:[%s387_s3] sm:$0xff]  ;;  %v66_v4 = vld [vmem:[%s387_s3 + $0x8] sm:$0xff]  ;;  %v299_v5 = vmov 1   ;;  %v300_v7 = vmov 0.0|0.0   ;;  %v38_v13 = vlaneseq }
   0x3   :  { %v245_v6 = vpack.c.bf16 %v66_v4, %v65_v3  ;;  %244 = vmatprep.subr.bf16.mxu0 %v300_v7  ;;  %v67_v8 = vld [vmem:[%s387_s3 + $0x10] sm:$0xff]  ;;  %v68_v9 = vld [vmem:[%s387_s3 + $0x18] sm:$0x3f]  ;;  %vm80_vm0 = vcmask 1045504   ;;  %vm301_vm1 = vmmov 1   ;;  %vm302_vm3 = vmmov 0  }
   0x4   :  { %v248_v10 = vpack.c.bf16 %v68_v9, %v67_v8  ;;  %vm249_vm2 = vmpackc.low %vm80_vm0, %vm301_vm1  ;;  %v303_v11 = vmov 0.0   ;;  %v172_v12 = vld [vmem:[%s389_s5] sm:$0xff]  ;;  %s304_s8 = smov 1   ;;  %v39_v14 = vshrl.u32 %v38_v13, 7  ;;  %vm76_vm4 = vcmask 244736  }
   0x5   :  { %246 = vmatpush3.bf16.msra.mxu0 %v245_v6  ;;  %241 = vmatprep.mubr.msk.f32.mxu0 %vm302_vm3, %v303_v11  ;;  %v25_v16 = vld [vmem:[%s385_s1] sm:$0x7]  ;;  %v186_v59 = vand.u32 127, %v38_v13 }
   0x6   :  { %262 = vset.pattern.permute.xlu0 %v299_v5  ;;  %265 = vset.pattern.permute.xlu1 %v299_v5  ;;  %v40_v15 = vsub.s32 0, %v39_v14  ;;  %v50_v18 = vsub.s32 1, %v39_v14  ;;  %v60_v19 = vsub.s32 2, %v39_v14  ;;  %v223_v24 = vld [vmem:[%s386_s2] ss:$0 sm:$0xff]  ;;  %s305_s2 = smov 127  }
   0x7   :  { %45 = vperm.xlu0 %262, %v24_v0   ;;  %247 = vmatprep.subr.bf16.mxu0 %v300_v7  ;;  %v224_v33 = vld [vmem:[%s388_s4] ss:$0 sm:$0xff]  ;;  %vm189_vm6 = vcmp.eq.s32.totalorder %v186_v59, 2  ;;  %vm188_vm7 = vcmp.eq.s32.totalorder %v186_v59, 1  ;;  %s306_s4 = smov [#allocation2]   ;;  %vm187_vm8 = vcmp.eq.s32.totalorder %v186_v59, 0 }
   0x8   :  { %174 = vrot.lane.b32.xlu1 %v172_v12, %s304_s8  ;;  %v41_v17 = vrot.slane %v25_v16, %v40_v15  ;;  %v51_v22 = vrot.slane %v25_v16, %v50_v18  ;;  %v61_v23 = vrot.slane %v25_v16, %v60_v19  ;;  %s215_s12 = sshll.u32 %s306_s4, 4  ;;  %s216_s12 = int_to_ptr.vmem [resolvable:$true] %s215_s12 }
   0x9   :  { %250 = vmatpush3.bf16.msk.msra.mxu0 %vm249_vm2, %v248_v10  ;;  %s273_s13 = scalar_lea.vmem %s216_s12, 128  ;;  %p278_p1 = scmp.lt.s32.totalorder %s216_s12, %s216_s12 }
   0xa   :  { %p274_p0 = scmp.ne.s32.totalorder %s216_s12, %s273_s13  ;;  %p279_p2 = scmp.lt.s32.totalorder %s273_s13, %s273_s13 }
   0xb   :  { %264 = vset.pattern.permute.xlu0 %v297_v1 }
   0xc   :  { %p280_p3 = por %p279_p2, %p278_p1 }
   0xe   :  { %p281_p4 = pnand %p280_p3, %p274_p0 }
  0x81   :  { %v36_v20 = vpop.permute.xlu0 %35  ;;  %v56_v25 = vpop.permute.xlu1 %55 }
  0x82   :  { %v42_v21 = vmul.f32 %v41_v17, %v36_v20  ;;  %v62_v29 = vmul.f32 %v61_v23, %v56_v25 }
  0x84   :  { %v43_v27 = vadd.f32 %v223_v24, %v42_v21 }
  0x85   :  { %v175_v51 = vpop.permute.xlu1 %174 }
  0x86   :  { %v46_v26 = vpop.permute.xlu0 %45 }
  0x87   :  { %v52_v28 = vmul.f32 %v51_v22, %v46_v26 }
  0x89   :  { %v53_v30 = vadd.f32 %v52_v28, %v43_v27 }
  0x8b   :  { %v63_v31 = vadd.f32 %v62_v29, %v53_v30 }
  0x8d   :  { %v64_v32 = vmax.f32 %v63_v31, 0.0 }
  0x8f   :  { %242 = vmatmul.mubr.msk.f32.vlgmr.msra.gmra.mrb[0].mxu0 %vm76_vm4, %v64_v32 }
 0x162   :  { %v150_v34 = vpop.f32.mrb[0].mxu0 }
 0x163   :  { %v151_v35 = vadd.f32 %v224_v33, %v150_v34  ;;  %v243_v36 = vpop.f32.mrb[1].mxu0 }
 0x165   :  { %v157_v37 = vand.u32 2147483647, %v151_v35  ;;  %v156_v48 = vmax.f32 %v151_v35, 0.0 }
 0x167   :  { %v158_v38 = vsub.f32 0.0, %v157_v37 }
 0x169   :  { %v159_v39 = vmul.f32 1.442695, %v158_v38 }
 0x16b   :  { %267 = vpow2.f32 %v159_v39 }
 0x175   :  { %v268_v40 = vpop.eup %267 }
 0x176   :  { %v161_v41 = vadd.f32 1.0, %v268_v40  ;;  %v164_v42 = vmul.f32 -0.5, %v268_v40  ;;  %v167_v44 = vand.u32 2147483647, %v268_v40 }
 0x178   :  { %269 = vlog2.f32 %v161_v41  ;;  %v165_v43 = vadd.f32 1.0, %v164_v42  ;;  %vm168_vm5 = vcmp.lt.f32.partialorder %v167_v44, 0.0004427343 }
 0x179   :  { %271 = vtanh.f32 %v151_v35 }
 0x17a   :  { %v166_v47 = vmul.f32 %v268_v40, %v165_v43 }
 0x182   :  { %v270_v45 = vpop.eup %269 }
 0x183   :  { %v163_v46 = vmul.f32 0.6931472, %v270_v45  ;;  %v272_v54 = vpop.eup %271 }
 0x184   :  { %v155_v55 = vmul.f32 2.0, %v272_v54 }
 0x185   :  { %v169_v49 = vsel %vm168_vm5, %v166_v47, %v163_v46 }
 0x186   :  { %v170_v50 = vadd.f32 %v169_v49, %v156_v48 }
 0x188   :  { %v171_v52 = vadd.f32 0.1, %v170_v50 }
 0x18a   :  { %v177_v53 = vmul.f32 %v175_v51, %v171_v52 }
 0x18c   :  { %179 = vrot.lane.b32.xlu1 %v177_v53, %s305_s2 }
 0x190   :  { %198 = vperm.xlu1 %265, %v171_v52  }
 0x194   :  { %266 = vset.pattern.permute.xlu1 %v297_v1 }
 0x195   :  { %204 = vperm.xlu1 %266, %v155_v55  }
 0x1fe   :  { %v180_v56 = vpop.permute.xlu1 %179 }
 0x1ff   :  { %v182_v57 = vadd.f32 %v180_v56, %v155_v55 }
 0x201   :  { %v227_v58 = vclamps-f32 %v182_v57, 2.0 }
 0x203   :  { %192 = vperm.xlu0 %264, %v227_v58  }
 0x20f   :  { %v199_v60 = vpop.permute.xlu1 %198 }
 0x214   :  { %v205_v63 = vpop.permute.xlu1 %204 }
 0x282   :  { %v193_v61 = vpop.permute.xlu0 %192 }
 0x283   :  { %v195_v62 = vsel %vm189_vm6, %v193_v61, 0.0 }
 0x284   :  { %v201_v0 = vsel %vm188_vm7, %v199_v60, %v195_v62 }
 0x285   :  { %v207_v2 = vsel %vm187_vm8, %v205_v63, %v201_v0 }
 0x286   :  { %208 = vst [vmem:[#allocation2] sm:$0xff] %v207_v2 }
 0x287   :  { %284 = shalt.err (!%p281_p4)
}
 0x288   :  { %s285_s16 = scalar_lea.hbm %s390_s6, 128 }
 0x289   :  { %p286_p5 = scmp.ne.s32.totalorder %s390_s6, %s285_s16  ;;  %p289_p6 = scmp.lt.u32.totalorder %s285_s16, %s390_s6 }
 0x28b   :  { %p291_p7 = pnand %p289_p6, %p286_p5 }
 0x28d   :  { %294 = shalt.err (!%p291_p7)
}
 0x28e   :  { %218 = dma.vmem_to_hbm [thread:$0]  %s216_s12, 128, %s390_s6, [#allocation3]  }
 0x28f   :  { %295 = dma.done.wait [#allocation3], 128  }
 0x290   :  { %296 = vsyncadd [#allocation3], 4294967168 }
 0x291   :  { %222 = vsyncpa [#allocation3], 1 }

</bundles_post_ra>
